<compile_context>
chip_gen: v6e
topology: v6e:2x2x1
jax: 0.10.0
libtpu: 0.0.40
codegen_flags: <defaults>
</compile_context>

<pallas_src>
import jax
import jax.numpy as jnp
from jax import lax
from jax.experimental import pallas as pl
from jax.experimental.pallas import tpu as pltpu


def _cdiv(a: int, b: int) -> int:
    return -(-a // b)


def _round_up(x: int, m: int) -> int:
    return _cdiv(x, m) * m


def _vmem_budget_bytes() -> int:
    """~80% of this generation's physical VMEM (64 MiB v7x-safe fallback)."""
    cap = 64 * 1024 * 1024
    try:
        info = pltpu.get_tpu_info()
        cap = int(getattr(info, "vmem_capacity_bytes", cap)) or cap
    except Exception:  # API drift / not queryable -> conservative default
        pass
    return int(0.8 * cap)


_NO_TILE_CAP = 2048   # max K / N extent kept as a single (untiled) block
_TILE_N = 512         # N tile when tiling (multiple of 256)
_TILE_K = 512         # K tile when tiling (multiple of 256)


def _plan_operator_tiles(out_dim: int, in_dim: int, budget_bytes: int):
    """Static (per-operator) padding and N/K tile sizes."""
    del budget_bytes  # worst-case tiles below always fit >= 0.8 * 64 MiB
    k2 = 2 * out_dim
    n2 = 2 * in_dim

    # Lane-dense, complex-interleaved output axis: pad to 128 f32 lanes,
    # prefer 256 (v6e/v7x MXU width) when the extra padding is small.
    n2p = _round_up(n2, 128)
    if n2p % 256 != 0 and (_round_up(n2, 256) - n2) <= max(32, n2 // 8):
        n2p = _round_up(n2, 256)

    if n2p <= _NO_TILE_CAP:
        tn = n2p
    else:
        tn = _TILE_N
        n2p = _round_up(n2p, tn)

    if k2 <= _NO_TILE_CAP:
        tk, k2p = k2, k2
    else:
        tk = _TILE_K
        k2p = _round_up(k2, tk)

    return n2p, k2p, tn, tk


def _build_block_matrix(A: jnp.ndarray, k2p: int, n2p: int) -> jnp.ndarray:
    """Interleaved real block form B of (. @ conj(A)).

    B[2j+s, 2i+t] is chosen so that with Yint[m, 2j+s] = (Re,Im)[s](y[m, j]):
        (Yint @ B)[m, 2i+t] = (Re,Im)[t]( sum_j conj(A[j, i]) * y[m, j] )
    i.e. the kernel's f32 output is already complex64-interleaved along lanes.
    Rows/cols are zero-padded to (k2p, n2p) for sublane/lane alignment.
    """
    out_dim, in_dim = A.shape
    ar = jnp.real(A).astype(jnp.float32)
    ai = jnp.imag(A).astype(jnp.float32)
    rows_re = jnp.stack([ar, -ai], axis=-1)   # s = 0 rows (Re of y)
    rows_im = jnp.stack([ai, ar], axis=-1)    # s = 1 rows (Im of y)
    b = jnp.stack([rows_re, rows_im], axis=1).reshape(2 * out_dim, 2 * in_dim)
    return jnp.pad(b, ((0, k2p - 2 * out_dim), (0, n2p - 2 * in_dim)))


def _ct_kernel(y_ref, b_ref, o_ref):
    # Output block is revisited across the (last, "arbitrary") K grid axis and
    # stays resident in VMEM: zero it on the first K step, accumulate in f32.
    @pl.when(pl.program_id(2) == 0)
    def _():
        o_ref[...] = jnp.zeros_like(o_ref)

    o_ref[...] += jnp.dot(y_ref[...], b_ref[...],
                          preferred_element_type=jnp.float32)


def _ct_apply_impl(y, b_block, *, in_dim, tn, tk, budget):
    bsz, ch, out_dim = y.shape
    M = bsz * ch
    k2 = 2 * out_dim
    k2p, n2p = b_block.shape

    # Y -> interleaved-real layout [Re0, Im0, Re1, Im1, ...] along K.
    # One fused split pass; no separate concatenated copy beyond it.
    # TODO(synk): would be a zero-copy bitcast if JAX allowed complex bitcasts.
    yint = jnp.stack(
        [jnp.real(y).astype(jnp.float32), jnp.imag(y).astype(jnp.float32)],
        axis=-1,
    ).reshape(M, k2)

    # Row tile: as large as the per-generation VMEM budget allows (cap 1024),
    # multiple of 8 sublanes, chosen to minimize row-padding waste.
    bytes_fixed = 2 * tk * tn * 4          # double-buffered operator tiles
    per_row = 2 * (tk + tn) * 4            # double-buffered Y + output tiles
    tm_cap = max(8, min(1024, int((budget - bytes_fixed) // per_row) // 8 * 8))
    tm = min(tm_cap, _round_up(_cdiv(M, _cdiv(M, tm_cap)), 8))
    mp = _round_up(M, tm)

    if mp != M or k2p != k2:
        yint = jnp.pad(yint, ((0, mp - M), (0, k2p - k2)))

    grid = (mp // tm, n2p // tn, k2p // tk)

    need = bytes_fixed + tm * per_row
    vmem_limit = int(min(budget, max(2 * need, 16 * 1024 * 1024)))

    out = pl.pallas_call(
        _ct_kernel,
        out_shape=jax.ShapeDtypeStruct((mp, n2p), jnp.float32),
        grid_spec=pltpu.PrefetchScalarGridSpec(
            num_scalar_prefetch=0,
            grid=grid,
            in_specs=[
                # Y tiles stream over (M, K); auto double-buffered.
                pl.BlockSpec((tm, tk), lambda i, j, k: (i, k)),
                # Operator tiles stream over (K, N); constant across M.
                pl.BlockSpec((tk, tn), lambda i, j, k: (k, j)),
            ],
            out_specs=pl.BlockSpec((tm, tn), lambda i, j, k: (i, j)),
        ),
        compiler_params=pltpu.CompilerParams(
            dimension_semantics=("parallel", "parallel", "arbitrary"),
            vmem_limit_bytes=vmem_limit,
        ),
    )(yint, b_block)

    # Output lanes are already [Re0, Im0, Re1, Im1, ... | zero-pad]:
    # one fused reshape/slice/complex pass, no lane-misaligned Im slice.
    out3 = out[:M].reshape(M, n2p // 2, 2)[:, :in_dim]
    res = lax.complex(out3[..., 0], out3[..., 1])
    return res.reshape(bsz, ch, in_dim)


_ct_apply = jax.jit(_ct_apply_impl,
                    static_argnames=("in_dim", "tn", "tk", "budget"))


class ConjugateTransposeMatrixOperator:
    """Pallas-TPU forward pass of ConjugateTransposeMatrixOperator for a dense
    complex base operator A (out_dim, in_dim): forward(y) = A^H y per (b,c) row.

    The interleaved real block matrix (the only per-operator tensor the kernel
    reads) is built ONCE here, so repeated forward() calls only stream y / out.
    """

    def __init__(self, A):
        A = jnp.asarray(A, dtype=jnp.complex64)
        assert A.ndim == 2
        self.out_dim, self.in_dim = A.shape
        self._budget = _vmem_budget_bytes()
        self._n2p, self._k2p, self._tn, self._tk = _plan_operator_tiles(
            self.out_dim, self.in_dim, self._budget)
        self._b_block = _build_block_matrix(A, self._k2p, self._n2p)

    def forward(self, y: jnp.ndarray) -> jnp.ndarray:
        assert y.ndim == 3 and y.shape[-1] == self.out_dim
        return _ct_apply(y, self._b_block, in_dim=self.in_dim,
                         tn=self._tn, tk=self._tk, budget=self._budget)

    __call__ = forward


if __name__ == "__main__":
    key = jax.random.PRNGKey(0)
    ka, kb, kc, kd = jax.random.split(key, 4)

    B, C = 2, 4
    in_dim, out_dim = 32, 16  # base operator A: (out_dim, in_dim)

    # Deterministic synthetic "parameters" for the dense base operator.
    A = (jax.random.normal(ka, (out_dim, in_dim), dtype=jnp.float32)
         + 1j * jax.random.normal(kb, (out_dim, in_dim), dtype=jnp.float32)
         ).astype(jnp.complex64)

    # Input to ConjugateTransposeMatrixOperator.forward lives in the base
    # operator's OUTPUT space: [B, C, out_dim].
    y = (jax.random.normal(kc, (B, C, out_dim), dtype=jnp.float32)
         + 1j * jax.random.normal(kd, (B, C, out_dim), dtype=jnp.float32)
         ).astype(jnp.complex64)

    op = ConjugateTransposeMatrixOperator(A)
    result = jax.block_until_ready(op.forward(y))

    # Reference: conj(A)^T y  ==  conj(A^T conj(y))  ==  A^H y
    ref = jnp.einsum("ji,bcj->bci", jnp.conj(A), y)
    assert result.shape == (B, C, in_dim)
    assert result.dtype == jnp.complex64
    assert jnp.allclose(result, ref, atol=1e-4, rtol=1e-4)

    print("KERNEL_OK")
</pallas_src>

<mosaic_0001>
module attributes {stable_mosaic.version = 11 : i64} {
  func.func @_ct_kernel(%arg0: i32, %arg1: i32, %arg2: i32, %arg3: memref<8x32xf32, #tpu.memory_space<vmem>>, %arg4: memref<32x128xf32, #tpu.memory_space<vmem>>, %arg5: memref<8x128xf32, #tpu.memory_space<vmem>>) attributes {dimension_semantics = [#tpu.dimension_semantics<parallel>, #tpu.dimension_semantics<parallel>, #tpu.dimension_semantics<arbitrary>], iteration_bounds = array<i64: 1, 1, 1>, scalar_prefetch = 0 : i64, scratch_operands = 0 : i64, tpu.core_type = #tpu.core_type<tc>, window_params = [{transform_indices = @transform_0, window_bounds = array<i64: 8, 32>}, {transform_indices = @transform_1, window_bounds = array<i64: 32, 128>}, {transform_indices = @transform_2, window_bounds = array<i64: 8, 128>}]} {
    %c0_i32 = arith.constant 0 : i32
    %0 = arith.cmpi eq, %arg2, %c0_i32 : i32
    %1 = arith.extui %0 : i1 to i32
    %c0_i32_0 = arith.constant 0 : i32
    %2 = arith.cmpi ne, %1, %c0_i32_0 : i32
    scf.if %2 {
      %cst_8 = arith.constant 0.000000e+00 : f32
      %9 = vector.broadcast %cst_8 : f32 to vector<8x128xf32>
      %c0_9 = arith.constant 0 : index
      %c0_10 = arith.constant 0 : index
      %10 = vector.load %arg5[%c0_9, %c0_10] : memref<8x128xf32, #tpu.memory_space<vmem>>, vector<8x128xf32>
      tpu.vector_store %arg5[%c0_9, %c0_10], %9 {strides = array<i32>} : memref<8x128xf32, #tpu.memory_space<vmem>>, vector<8x128xf32>,
    } else {
    }
    %c0 = arith.constant 0 : index
    %c0_1 = arith.constant 0 : index
    %3 = vector.load %arg5[%c0, %c0_1] : memref<8x128xf32, #tpu.memory_space<vmem>>, vector<8x128xf32>
    %c0_2 = arith.constant 0 : index
    %c0_3 = arith.constant 0 : index
    %4 = vector.load %arg3[%c0_2, %c0_3] : memref<8x32xf32, #tpu.memory_space<vmem>>, vector<8x32xf32>
    %c0_4 = arith.constant 0 : index
    %c0_5 = arith.constant 0 : index
    %5 = vector.load %arg4[%c0_4, %c0_5] : memref<32x128xf32, #tpu.memory_space<vmem>>, vector<32x128xf32>
    %cst = arith.constant dense<0.000000e+00> : vector<8x128xf32>
    %6 = tpu.matmul %4, %5, %cst {dimension_numbers = #tpu.dot_dimension_numbers<[1], [0], [0], [1], [0, 0, 1, 1], [], []>} : vector<8x32xf32>, vector<32x128xf32>, vector<8x128xf32> -> vector<8x128xf32>
    %7 = arith.addf %3, %6 : vector<8x128xf32>
    %c0_6 = arith.constant 0 : index
    %c0_7 = arith.constant 0 : index
    %8 = vector.load %arg5[%c0_6, %c0_7] : memref<8x128xf32, #tpu.memory_space<vmem>>, vector<8x128xf32>
    tpu.vector_store %arg5[%c0_6, %c0_7], %7 {strides = array<i32>} : memref<8x128xf32, #tpu.memory_space<vmem>>, vector<8x128xf32>,
    return
  }
  func.func @transform_0(%arg0: i32, %arg1: i32, %arg2: i32) -> (i32, i32) {
    %c0_i32 = arith.constant 0 : i32
    return %arg0, %arg2 : i32, i32
  }
  func.func @transform_1(%arg0: i32, %arg1: i32, %arg2: i32) -> (i32, i32) {
    %c0_i32 = arith.constant 0 : i32
    return %arg2, %arg1 : i32, i32
  }
  func.func @transform_2(%arg0: i32, %arg1: i32, %arg2: i32) -> (i32, i32) {
    %c0_i32 = arith.constant 0 : i32
    return %arg0, %arg1 : i32, i32
  }
}

</mosaic_0001>

<bundles_post_ra>
// kernel: custom-call.1
= control target key start
LH: loop header
LB: loop body
LE: loop exit
PB: predicated region body
PF: predicated region fallthrough
CT: control target
= control target key end

     0   :  { %s51_s0 = inlined_call_operand.hbm [shape: c64[2,4,16], index: 0, kind: input, shape index: {}]   ;;  %s52_s1 = inlined_call_operand.vmem [shape: f32[2,4,16], index: 1, kind: output, shape index: {}]  }
   0x1   :  { %s2_s8 = scalar_lea.hbm %s51_s0, 128 }
   0x2   :  { %3 = vsyncpa [#allocation0], 0  ;;  %s4_s11 = sshll.u32 %s52_s1, 4  ;;  %s5_s11 = int_to_ptr.vmem [resolvable:$true] %s4_s11 }
   0x3   :  { %s20_s12 = scalar_lea.vmem %s5_s11, 128  ;;  %p25_p1 = scmp.lt.s32.totalorder %s5_s11, %s5_s11 }
   0x4   :  { %p21_p0 = scmp.ne.s32.totalorder %s5_s11, %s20_s12  ;;  %p26_p2 = scmp.lt.s32.totalorder %s20_s12, %s20_s12 }
   0x6   :  { %p27_p3 = por %p26_p2, %p25_p1 }
   0x8   :  { %p28_p4 = pnand %p27_p3, %p21_p0 }
   0xa   :  { %31 = shalt.err (!%p28_p4)  }
   0xb   :  { %7 = dma.hbm_to_vmem [thread:$0]  %s2_s8, 128, %s5_s11, [#allocation0] }
   0xc   :  { %33 = dma.done.wait [#allocation0], 128  }
   0xd   :  { %34 = vsyncadd [#allocation0], 4294967168 }
   0xe   :  { %9 = vsyncpa [#allocation0], 1 }

// kernel: custom-call
= control target key start
LH: loop header
LB: loop body
LE: loop exit
PB: predicated region body
PF: predicated region fallthrough
CT: control target
= control target key end

     0   :  { %2 = vsyncpa [#allocation0], 0  ;;  %s47_s0 = inlined_call_operand.hbm [shape: c64[2,4,16], index: 0, kind: input, shape index: {}]   ;;  %s48_s1 = inlined_call_operand.vmem [shape: f32[2,4,16], index: 1, kind: output, shape index: {}]  }
   0x1   :  { %s3_s8 = sshll.u32 %s48_s1, 4  ;;  %s4_s8 = int_to_ptr.vmem [resolvable:$true] %s3_s8 }
   0x2   :  { %s17_s9 = scalar_lea.vmem %s4_s8, 128  ;;  %p22_p1 = scmp.lt.s32.totalorder %s4_s8, %s4_s8 }
   0x3   :  { %p18_p0 = scmp.ne.s32.totalorder %s4_s8, %s17_s9  ;;  %p23_p2 = scmp.lt.s32.totalorder %s17_s9, %s17_s9 }
   0x5   :  { %p24_p3 = por %p23_p2, %p22_p1 }
   0x7   :  { %p25_p4 = pnand %p24_p3, %p18_p0 }
   0x9   :  { %28 = shalt.err (!%p25_p4)  }
   0xa   :  { %6 = dma.hbm_to_vmem [thread:$0]  %s47_s0, 128, %s4_s8, [#allocation0] }
   0xb   :  { %29 = dma.done.wait [#allocation0], 128  }
   0xc   :  { %30 = vsyncadd [#allocation0], 4294967168 }
   0xd   :  { %8 = vsyncpa [#allocation0], 1 }

// kernel: custom-call.2
= control target key start
LH: loop header
LB: loop body
LE: loop exit
PB: predicated region body
PF: predicated region fallthrough
CT: control target
= control target key end

     0   :  { %s92_s0 = inlined_call_operand.vmem [shape: f32[2,4,32], index: 0, kind: input, shape index: {}]   ;;  %s93_s1 = inlined_call_operand.vmem [shape: f32[2,4,32], index: 1, kind: input, shape index: {}]   ;;  %s94_s2 = inlined_call_operand.hbm [shape: c64[2,4,32], index: 2, kind: output, shape index: {}]  }
   0x1   :  { %s3_s11 = scalar_lea.hbm %s94_s2, 128 }
   0x2   :  { %4 = vsyncpa [#allocation0], 0  ;;  %s5_s14 = sshll.u32 %s92_s0, 4  ;;  %s6_s14 = int_to_ptr.vmem [resolvable:$true] %s5_s14 }
   0x3   :  { %s18_s15 = scalar_lea.vmem %s6_s14, 128  ;;  %p23_p1 = scmp.lt.s32.totalorder %s6_s14, %s6_s14 }
   0x4   :  { %p19_p0 = scmp.ne.s32.totalorder %s6_s14, %s18_s15  ;;  %p24_p2 = scmp.lt.s32.totalorder %s18_s15, %s18_s15 }
   0x6   :  { %p25_p3 = por %p24_p2, %p23_p1 }
   0x8   :  { %p26_p4 = pnand %p25_p3, %p19_p0 }
   0xa   :  { %29 = shalt.err (!%p26_p4)  }
   0xb   :  { %8 = dma.vmem_to_hbm [thread:$0]  %s6_s14, 128, %s94_s2, [#allocation0] }
   0xc   :  { %61 = dma.done.wait [#allocation0], 128  }
   0xd   :  { %62 = vsyncadd [#allocation0], 4294967168 }
   0xe   :  { %10 = vsyncpa [#allocation0], 1 }
   0xf   :  { %11 = vsyncpa [#allocation1], 0  ;;  %s12_s0 = sshll.u32 %s93_s1, 4  ;;  %s13_s0 = int_to_ptr.vmem [resolvable:$true] %s12_s0 }
  0x10   :  { %s38_s20 = scalar_lea.vmem %s13_s0, 128  ;;  %p43_p6 = scmp.lt.s32.totalorder %s13_s0, %s13_s0 }
  0x11   :  { %p39_p5 = scmp.ne.s32.totalorder %s13_s0, %s38_s20  ;;  %p44_p7 = scmp.lt.s32.totalorder %s38_s20, %s38_s20 }
  0x13   :  { %p45_p8 = por %p44_p7, %p43_p6 }
  0x15   :  { %p46_p9 = pnand %p45_p8, %p39_p5 }
  0x17   :  { %49 = shalt.err (!%p46_p9)  }
  0x18   :  { %15 = dma.vmem_to_hbm [thread:$0]  %s13_s0, 128, %s3_s11, [#allocation1] }
  0x19   :  { %63 = dma.done.wait [#allocation1], 128  }
  0x1a   :  { %64 = vsyncadd [#allocation1], 4294967168 }
  0x1b   :  { %17 = vsyncpa [#allocation1], 1 }

// kernel: _ct_apply_impl.1
= control target key start
LH: loop header
LB: loop body
LE: loop exit
PB: predicated region body
PF: predicated region fallthrough
CT: control target
= control target key end

     0   :  { %v121_v0 = vmov 0.0   ;;  %vm122_vm0 = vmmov 0   ;;  %vm22_vm1 = vcmask 261120   ;;  %s156_s1 = inlined_call_operand.vmem [shape: f32[32,128], index: 1, kind: input, shape index: {}]   ;;  %s157_s0 = inlined_call_operand.vmem [shape: f32[8,32], index: 0, kind: input, shape index: {}]   ;;  %s158_s2 = inlined_call_operand.vmem [shape: f32[8,128], index: 2, kind: output, shape index: {}]  }
   0x1   :  { %108 = vmatprep.subr.mxu0 %v121_v0  ;;  %v21_v1 = vld [vmem:[%s156_s1 + $0x18] sm:$0xff]  ;;  %v20_v2 = vld [vmem:[%s156_s1 + $0x10] sm:$0xff]  ;;  %116 = vmatprep.mubr.msk.f32.mxu0 %vm122_vm0, %v121_v0  ;;  %v19_v3 = vld [vmem:[%s156_s1 + $0x8] sm:$0xff] }
   0x2   :  { %109 = vmatpush3.msra.mxu0 %v21_v1  ;;  %v18_v4 = vld [vmem:[%s156_s1] sm:$0xff] }
   0x3   :  { %110 = vmatprep.subr.mxu0 %v121_v0  ;;  %v17_v5 = vld [vmem:[%s157_s0] sm:$0xff] }
   0x4   :  { %111 = vmatpush3.msra.mxu0 %v20_v2 }
   0x5   :  { %112 = vmatprep.subr.mxu0 %v121_v0 }
   0x6   :  { %113 = vmatpush3.msra.mxu0 %v19_v3 }
   0x7   :  { %114 = vmatprep.subr.mxu0 %v121_v0 }
   0x8   :  { %115 = vmatpush3.msra.mxu0 %v18_v4 }
   0x9   :  { %117 = vmatmul.mubr.msk.f32.vlgmr.msra.gmra.mxu0 %vm22_vm1, %v17_v5 }
  0xc9   :  { %v92_v6 = vpop.f32.mrf.mxu0 }
  0xca   :  { %97 = vst [vmem:[%s158_s2] sm:$0xff] %v92_v6 }
  0xcb   :  { %v118_v7 = vpop.f32.mrf.mxu0 }

</bundles_post_ra>
